<compile_context>
chip_gen: v7x
topology: tpu7x:2x2x1
jax: 0.10.0
libtpu: 0.0.40
codegen_flags: <defaults>
</compile_context>

<pallas_src>
import functools
import math

import jax
import jax.numpy as jnp
from jax import lax
from jax.experimental import pallas as pl
from jax.experimental.pallas import tpu as pltpu


def _round_up(x, m):
    return (x + m - 1) // m * m


def _pad_axis(a, axis, new_size):
    pad = new_size - a.shape[axis]
    if pad <= 0:
        return a
    widths = [(0, 0)] * a.ndim
    widths[axis] = (0, pad)
    return jnp.pad(a, widths)


def _gelu(g, approximate):
    if approximate:
        # tanh-GELU: transcendental lands on the otherwise-idle EUP slot.
        c = math.sqrt(2.0 / math.pi)
        return 0.5 * g * (1.0 + jnp.tanh(c * (g + 0.044715 * g * g * g)))
    # Exact erf GELU -- matches PyTorch F.gelu default.
    return 0.5 * g * (1.0 + lax.erf(g * (1.0 / math.sqrt(2.0))))


def _geglu_kernel_fused_k(x_ref, wv_ref, wg_ref, b_ref, o_ref, *,
                          n_axis, num_n_blocks, approximate_gelu):
    """Collapsed-K kernel: full-K panels, no accumulator scratch."""
    j = pl.program_id(n_axis)
    x = x_ref[...]
    v = jnp.dot(x, wv_ref[...], preferred_element_type=jnp.float32)
    g = jnp.dot(x, wg_ref[...], preferred_element_type=jnp.float32)
    # Bias is resident in VMEM (constant index_map); slice the (1, tn) rows.
    bv = b_ref[pl.ds(j, 1), :]
    bg = b_ref[pl.ds(j + num_n_blocks, 1), :]
    v = v + bv
    g = g + bg
    o_ref[...] = (v * _gelu(g, approximate_gelu)).astype(o_ref.dtype)


def _geglu_kernel_ktiled(x_ref, wv_ref, wg_ref, b_ref, o_ref,
                         acc_v_ref, acc_g_ref, *, num_n_blocks,
                         approximate_gelu):
    """K-tiled kernel with f32 accumulator scratch (bias folded into init)."""
    j = pl.program_id(1)
    k = pl.program_id(2)

    @pl.when(k == 0)
    def _init():
        acc_v_ref[...] = jnp.broadcast_to(b_ref[pl.ds(j, 1), :],
                                          acc_v_ref.shape)
        acc_g_ref[...] = jnp.broadcast_to(b_ref[pl.ds(j + num_n_blocks, 1), :],
                                          acc_g_ref.shape)

    x = x_ref[...]
    acc_v_ref[...] += jnp.dot(x, wv_ref[...], preferred_element_type=jnp.float32)
    acc_g_ref[...] += jnp.dot(x, wg_ref[...], preferred_element_type=jnp.float32)

    @pl.when(k == pl.num_programs(2) - 1)
    def _finalize():
        o_ref[...] = (acc_v_ref[...] * _gelu(acc_g_ref[...], approximate_gelu)
                      ).astype(o_ref.dtype)


# Keep double-buffered operand panels comfortably below v7x's 64 MiB physical
# VMEM (minus compiler-internal scratch); v5e/v6e have 128 MiB so this is safe
# everywhere.
_OPERAND_VMEM_BUDGET = 36 << 20
_VMEM_LIMIT_CAP = 52 << 20


def geglu(x, w, b, *, tm=256, tn=512, tk=1024, matmul_dtype="auto",
          approximate_gelu=False, collapse_k=None):
    """GEGLU: value, gate = (x @ w + b).chunk(2, -1); out = value * gelu(gate).

    x: (B, T, dim_in); w: (dim_in, 2*dim_out)  (i.e. nn.Linear weight^T);
    b: (2*dim_out,).

    matmul_dtype: "auto" (default) casts f32 inputs to bf16 for the fast MXU
      path (f32 accumulation is kept); pass None for exact f32 matmul.
    collapse_k: None = auto (collapse when panels fit VMEM), True/False force.
    """
    B, T, dim_in = x.shape
    two_dim_out = w.shape[1]
    assert two_dim_out % 2 == 0
    dim_out = two_dim_out // 2
    out_dtype = x.dtype

    if matmul_dtype == "auto":
        matmul_dtype = jnp.bfloat16 if x.dtype == jnp.float32 else None
    if matmul_dtype is not None:
        x = x.astype(matmul_dtype)
        w = w.astype(matmul_dtype)

    M = B * T
    x2d = x.reshape(M, dim_in)
    in_b = jnp.dtype(x2d.dtype).itemsize
    w_b = jnp.dtype(w.dtype).itemsize
    o_b = jnp.dtype(out_dtype).itemsize

    # ---------- M / N tile selection (lane/sublane aligned) ----------
    tm_eff = min(tm, _round_up(M, 16))
    m_pad = _round_up(M, tm_eff)
    grid_m = m_pad // tm_eff

    tn_eff = min(tn, _round_up(dim_out, 128))
    # v7x has 2 TensorCores per chip: avoid a 1x1 "parallel" grid when N can
    # be split instead.
    if grid_m == 1 and dim_out > 128:
        tn_eff = min(tn_eff, _round_up(-(-dim_out // 2), 128))
    n_pad = _round_up(dim_out, tn_eff)
    grid_n = n_pad // tn_eff

    # ---------- K handling: collapse when the full-K panels fit VMEM ----------
    k_full = _round_up(dim_in, 128)

    def collapsed_bytes(kp):
        return (2 * tm_eff * kp * in_b           # x panel (double-buffered)
                + 2 * 2 * kp * tn_eff * w_b      # two weight panels
                + 2 * tm_eff * tn_eff * o_b      # output tile
                + 2 * 2 * n_pad * 4)             # resident bias

    if collapse_k is None:
        collapse_k = collapsed_bytes(k_full) <= _OPERAND_VMEM_BUDGET

    if collapse_k:
        tk_eff = k_full
        k_pad = k_full
        vmem_est = collapsed_bytes(k_pad)
    else:
        def tiled_bytes(tkc):
            return (2 * tm_eff * tkc * in_b
                    + 2 * 2 * tkc * tn_eff * w_b
                    + 2 * tm_eff * tn_eff * o_b
                    + 2 * tm_eff * tn_eff * 4 * 2    # f32 accumulator scratch
                    + 2 * 2 * n_pad * 4)

        tk_eff = min(_round_up(tk, 128), k_full)
        while tiled_bytes(tk_eff) > _OPERAND_VMEM_BUDGET and tk_eff > 256:
            tk_eff = max(256, _round_up(tk_eff // 2, 128))
        k_pad = _round_up(dim_in, tk_eff)
        vmem_est = tiled_bytes(tk_eff)
    grid_k = k_pad // tk_eff

    # ---------- pad operands (no-op when already aligned) ----------
    # TODO(synk): for the M-only-ragged case this jnp.pad costs one extra HBM
    # pass over x; a clamped index_map + masked store would avoid it.
    x2d = _pad_axis(_pad_axis(x2d, 0, m_pad), 1, k_pad)

    if n_pad != dim_out:
        wv = _pad_axis(w[:, :dim_out], 1, n_pad)
        wg = _pad_axis(w[:, dim_out:], 1, n_pad)
        w_p = jnp.concatenate([wv, wg], axis=1)
        bv = _pad_axis(b[:dim_out], 0, n_pad)
        bg = _pad_axis(b[dim_out:], 0, n_pad)
        b_p = jnp.concatenate([bv, bg], axis=0)
    else:
        w_p, b_p = w, b
    w_p = _pad_axis(w_p, 0, k_pad)
    # Bias as (2*grid_n, tn): row j = value block j, row grid_n + j = gate
    # block j.  Constant index_map -> DMA'd into VMEM once.
    b2d = b_p.astype(jnp.float32).reshape(2 * grid_n, tn_eff)

    vmem_limit = int(min(max(vmem_est + (8 << 20), 32 << 20), _VMEM_LIMIT_CAP))

    # ---------- grid + BlockSpecs ----------
    if collapse_k:
        # Pick which operand stays HBM-resident across the inner grid axis so
        # the LARGER operand is streamed from HBM exactly once.
        x_bytes_total = m_pad * k_pad * in_b
        w_bytes_total = k_pad * 2 * n_pad * w_b
        weight_resident = w_bytes_total * grid_m > x_bytes_total * grid_n
        if weight_resident:
            # grid = (n, m): weight panel (j) is outer -> read once.
            grid = (grid_n, grid_m)
            n_axis = 0
            x_spec = pl.BlockSpec((tm_eff, k_pad), lambda j, i: (i, 0))
            wv_spec = pl.BlockSpec((k_pad, tn_eff), lambda j, i: (0, j))
            wg_spec = pl.BlockSpec((k_pad, tn_eff), lambda j, i: (0, j + grid_n))
            b_spec = pl.BlockSpec((2 * grid_n, tn_eff), lambda j, i: (0, 0))
            o_spec = pl.BlockSpec((tm_eff, tn_eff), lambda j, i: (i, j))
        else:
            # grid = (m, n): x panel (i) is outer -> read once.
            grid = (grid_m, grid_n)
            n_axis = 1
            x_spec = pl.BlockSpec((tm_eff, k_pad), lambda i, j: (i, 0))
            wv_spec = pl.BlockSpec((k_pad, tn_eff), lambda i, j: (0, j))
            wg_spec = pl.BlockSpec((k_pad, tn_eff), lambda i, j: (0, j + grid_n))
            b_spec = pl.BlockSpec((2 * grid_n, tn_eff), lambda i, j: (0, 0))
            o_spec = pl.BlockSpec((tm_eff, tn_eff), lambda i, j: (i, j))

        kernel = functools.partial(
            _geglu_kernel_fused_k, n_axis=n_axis, num_n_blocks=grid_n,
            approximate_gelu=approximate_gelu)
        scratch_shapes = []
        dim_sem = ("parallel", "parallel")
    else:
        grid = (grid_m, grid_n, grid_k)
        x_spec = pl.BlockSpec((tm_eff, tk_eff), lambda i, j, k: (i, k))
        wv_spec = pl.BlockSpec((tk_eff, tn_eff), lambda i, j, k: (k, j))
        wg_spec = pl.BlockSpec((tk_eff, tn_eff), lambda i, j, k: (k, j + grid_n))
        b_spec = pl.BlockSpec((2 * grid_n, tn_eff), lambda i, j, k: (0, 0))
        o_spec = pl.BlockSpec((tm_eff, tn_eff), lambda i, j, k: (i, j))

        kernel = functools.partial(
            _geglu_kernel_ktiled, num_n_blocks=grid_n,
            approximate_gelu=approximate_gelu)
        scratch_shapes = [
            pltpu.VMEM((tm_eff, tn_eff), jnp.float32),
            pltpu.VMEM((tm_eff, tn_eff), jnp.float32),
        ]
        dim_sem = ("parallel", "parallel", "arbitrary")

    out_padded = pl.pallas_call(
        kernel,
        out_shape=jax.ShapeDtypeStruct((m_pad, n_pad), out_dtype),
        grid_spec=pltpu.PrefetchScalarGridSpec(
            num_scalar_prefetch=0,
            grid=grid,
            in_specs=[x_spec, wv_spec, wg_spec, b_spec],
            out_specs=o_spec,
            scratch_shapes=scratch_shapes,
        ),
        compiler_params=pltpu.CompilerParams(
            dimension_semantics=dim_sem,
            vmem_limit_bytes=vmem_limit,
        ),
    )(x2d, w_p, w_p, b2d)

    return out_padded[:M, :dim_out].reshape(B, T, dim_out)


def geglu_reference(x, w, b):
    proj = jnp.einsum("btd,de->bte", x.astype(jnp.float32),
                      w.astype(jnp.float32)) + b.astype(jnp.float32)
    dim_out = w.shape[1] // 2
    a, g = proj[..., :dim_out], proj[..., dim_out:]
    return a * (0.5 * g * (1.0 + lax.erf(g / jnp.sqrt(2.0))))


def _make_inputs(key, B, T, dim_in, dim_out):
    kx, kw, kb = jax.random.split(key, 3)
    # nn.Linear(dim_in, 2*dim_out)-style init: U(-1/sqrt(dim_in), 1/sqrt(dim_in))
    bound = 1.0 / math.sqrt(dim_in)
    w = jax.random.uniform(kw, (dim_in, 2 * dim_out), jnp.float32, -bound, bound)
    b = jax.random.uniform(kb, (2 * dim_out,), jnp.float32, -bound, bound)
    x = jax.random.normal(kx, (B, T, dim_in), jnp.float32)
    return x, w, b


if __name__ == "__main__":
    key = jax.random.PRNGKey(0)
    k1, k2, k3, k4 = jax.random.split(key, 4)

    # 1) Small unaligned case (padding path), exact f32 matmul, collapsed K.
    B, T, di, do = 2, 8, 32, 32
    x, w, b = _make_inputs(k1, B, T, di, do)
    out = jax.block_until_ready(geglu(x, w, b, matmul_dtype=None))
    ref = geglu_reference(x, w, b)
    assert out.shape == (B, T, do)
    assert jnp.allclose(out, ref, atol=2e-5, rtol=2e-5)

    # 1b) Same shape, tanh (approximate) GELU -- v5e-friendly epilogue.
    out_t = jax.block_until_ready(
        geglu(x, w, b, matmul_dtype=None, approximate_gelu=True))
    assert jnp.allclose(out_t, ref, atol=1e-2, rtol=1e-2)

    # 2) Forced K-tiled path (accumulator scratch + pl.when init/finalize),
    #    exact f32 matmul, multi-block grid (2, 2, 2).
    B2, T2, di2, do2 = 2, 64, 256, 256
    x2, w2, b2 = _make_inputs(k2, B2, T2, di2, do2)
    out2 = jax.block_until_ready(
        geglu(x2, w2, b2, tm=64, tn=128, tk=128, matmul_dtype=None,
              collapse_k=False))
    ref2 = geglu_reference(x2, w2, b2)
    assert out2.shape == (B2, T2, do2)
    assert jnp.allclose(out2, ref2, atol=2e-5, rtol=2e-5)

    # 3) Collapsed K, weight-resident grid order (tiny M, larger weight),
    #    grid_n split for the 2-TensorCore heuristic.
    B3, T3, di3, do3 = 2, 8, 128, 256
    x3, w3, b3 = _make_inputs(k3, B3, T3, di3, do3)
    out3 = jax.block_until_ready(geglu(x3, w3, b3, matmul_dtype=None))
    ref3 = geglu_reference(x3, w3, b3)
    assert out3.shape == (B3, T3, do3)
    assert jnp.allclose(out3, ref3, atol=2e-5, rtol=2e-5)

    # 4) Default (bf16 "auto") MXU path, x-resident grid order (large M).
    B4, T4, di4, do4 = 2, 256, 128, 64
    x4, w4, b4 = _make_inputs(k4, B4, T4, di4, do4)
    out4 = jax.block_until_ready(geglu(x4, w4, b4))   # matmul_dtype="auto"
    ref4 = geglu_reference(x4, w4, b4)
    assert out4.shape == (B4, T4, do4)
    assert jnp.allclose(out4, ref4, atol=5e-2, rtol=5e-2)

    print("KERNEL_OK")
</pallas_src>

<mosaic_0001>
module attributes {stable_mosaic.version = 11 : i64} {
  func.func @_geglu_kernel_fused_k(%arg0: i32, %arg1: i32, %arg2: memref<16x128xf32, #tpu.memory_space<vmem>>, %arg3: memref<128x128xf32, #tpu.memory_space<vmem>>, %arg4: memref<128x128xf32, #tpu.memory_space<vmem>>, %arg5: memref<2x128xf32, #tpu.memory_space<vmem>>, %arg6: memref<16x128xf32, #tpu.memory_space<vmem>>) attributes {dimension_semantics = [#tpu.dimension_semantics<parallel>, #tpu.dimension_semantics<parallel>], iteration_bounds = array<i64: 1, 1>, scalar_prefetch = 0 : i64, scratch_operands = 0 : i64, tpu.core_type = #tpu.core_type<tc>, window_params = [{transform_indices = @transform_0, window_bounds = array<i64: 16, 128>}, {transform_indices = @transform_1, window_bounds = array<i64: 128, 128>}, {transform_indices = @transform_2, window_bounds = array<i64: 128, 128>}, {pipeline_mode = #tpu.pipeline_mode<synchronous>, transform_indices = @transform_3, window_bounds = array<i64: 2, 128>}, {transform_indices = @transform_4, window_bounds = array<i64: 16, 128>}]} {
    %c0 = arith.constant 0 : index
    %c0_0 = arith.constant 0 : index
    %0 = vector.load %arg2[%c0, %c0_0] : memref<16x128xf32, #tpu.memory_space<vmem>>, vector<16x128xf32>
    %c0_1 = arith.constant 0 : index
    %c0_2 = arith.constant 0 : index
    %1 = vector.load %arg3[%c0_1, %c0_2] : memref<128x128xf32, #tpu.memory_space<vmem>>, vector<128x128xf32>
    %cst = arith.constant dense<0.000000e+00> : vector<16x128xf32>
    %2 = tpu.matmul %0, %1, %cst {dimension_numbers = #tpu.dot_dimension_numbers<[1], [0], [0], [1], [0, 0, 1, 1], [], []>} : vector<16x128xf32>, vector<128x128xf32>, vector<16x128xf32> -> vector<16x128xf32>
    %c0_3 = arith.constant 0 : index
    %c0_4 = arith.constant 0 : index
    %3 = vector.load %arg4[%c0_3, %c0_4] : memref<128x128xf32, #tpu.memory_space<vmem>>, vector<128x128xf32>
    %cst_5 = arith.constant dense<0.000000e+00> : vector<16x128xf32>
    %4 = tpu.matmul %0, %3, %cst_5 {dimension_numbers = #tpu.dot_dimension_numbers<[1], [0], [0], [1], [0, 0, 1, 1], [], []>} : vector<16x128xf32>, vector<128x128xf32>, vector<16x128xf32> -> vector<16x128xf32>
    %5 = arith.index_cast %arg0 : i32 to index
    %c0_6 = arith.constant 0 : index
    %6 = vector.load %arg5[%5, %c0_6] : memref<2x128xf32, #tpu.memory_space<vmem>>, vector<1x128xf32>
    %c1_i32 = arith.constant 1 : i32
    %7 = arith.addi %arg0, %c1_i32 : i32
    %8 = arith.index_cast %7 : i32 to index
    %c0_7 = arith.constant 0 : index
    %9 = vector.load %arg5[%8, %c0_7] : memref<2x128xf32, #tpu.memory_space<vmem>>, vector<1x128xf32>
    %10 = vector.broadcast %6 : vector<1x128xf32> to vector<16x128xf32>
    %11 = arith.addf %2, %10 : vector<16x128xf32>
    %12 = vector.broadcast %9 : vector<1x128xf32> to vector<16x128xf32>
    %13 = arith.addf %4, %12 : vector<16x128xf32>
    %cst_8 = arith.constant 5.000000e-01 : f32
    %14 = vector.broadcast %cst_8 : f32 to vector<16x128xf32>
    %15 = arith.mulf %14, %13 : vector<16x128xf32>
    %cst_9 = arith.constant 0.707106769 : f32
    %16 = vector.broadcast %cst_9 : f32 to vector<16x128xf32>
    %17 = arith.mulf %13, %16 : vector<16x128xf32>
    %18 = math.erf %17 : vector<16x128xf32>
    %cst_10 = arith.constant 1.000000e+00 : f32
    %19 = vector.broadcast %cst_10 : f32 to vector<16x128xf32>
    %20 = arith.addf %19, %18 : vector<16x128xf32>
    %21 = arith.mulf %15, %20 : vector<16x128xf32>
    %22 = arith.mulf %11, %21 : vector<16x128xf32>
    %c0_11 = arith.constant 0 : index
    %c0_12 = arith.constant 0 : index
    %23 = vector.load %arg6[%c0_11, %c0_12] : memref<16x128xf32, #tpu.memory_space<vmem>>, vector<16x128xf32>
    tpu.vector_store %arg6[%c0_11, %c0_12], %22 {strides = array<i32>} : memref<16x128xf32, #tpu.memory_space<vmem>>, vector<16x128xf32>,
    return
  }
  func.func @transform_0(%arg0: i32, %arg1: i32) -> (i32, i32) {
    %c0_i32 = arith.constant 0 : i32
    %c0_i32_0 = arith.constant 0 : i32
    return %arg1, %c0_i32 : i32, i32
  }
  func.func @transform_1(%arg0: i32, %arg1: i32) -> (i32, i32) {
    %c0_i32 = arith.constant 0 : i32
    %c0_i32_0 = arith.constant 0 : i32
    return %c0_i32, %arg0 : i32, i32
  }
  func.func @transform_2(%arg0: i32, %arg1: i32) -> (i32, i32) {
    %c1_i32 = arith.constant 1 : i32
    %0 = arith.addi %arg0, %c1_i32 : i32
    %c0_i32 = arith.constant 0 : i32
    %c0_i32_0 = arith.constant 0 : i32
    return %c0_i32, %0 : i32, i32
  }
  func.func @transform_3(%arg0: i32, %arg1: i32) -> (i32, i32) {
    %c0_i32 = arith.constant 0 : i32
    %c0_i32_0 = arith.constant 0 : i32
    %c0_i32_1 = arith.constant 0 : i32
    return %c0_i32, %c0_i32_0 : i32, i32
  }
  func.func @transform_4(%arg0: i32, %arg1: i32) -> (i32, i32) {
    %c0_i32 = arith.constant 0 : i32
    return %arg1, %arg0 : i32, i32
  }
}

</mosaic_0001>

<bundles_post_ra>
// kernel: tpu_custom_call.1
= control target key start
LH: loop header
LB: loop body
LE: loop exit
PB: predicated region body
PF: predicated region fallthrough
CT: control target
= control target key end

     0   :  { %9 = vsyncpa [#allocation3], 0  ;;  %s675_s0 = inlined_call_operand.hbm [shape: f32[16,128], index: 0, kind: input, shape index: {}]   ;;  %s676_s1 = inlined_call_operand.hbm [shape: f32[128,256], index: 1, kind: input, shape index: {}]   ;;  %s677_s2 = inlined_call_operand.hbm [shape: f32[128,256], index: 2, kind: input, shape index: {}]   ;;  %s678_s3 = inlined_call_operand.vmem [shape: f32[2,128], index: 3, kind: input, shape index: {}]   ;;  %s679_s4 = inlined_call_operand.hbm [shape: f32[16,128], index: 4, kind: output, shape index: {}]  }
   0x1   :  { %10 = vsyncpa [#allocation6], 0 }
   0x2   :  { %11 = vsyncpa [#allocation4], 0  ;;  %s574_s15 = smov [#allocation5]   ;;  %s575_s17 = smov [#allocation2]  }
   0x3   :  { %s29_s16 = sshll.u32 %s574_s15, 4  ;;  %s17_s18 = sshll.u32 %s575_s17, 4  ;;  %s30_s16 = int_to_ptr.vmem [resolvable:$true] %s29_s16  ;;  %s18_s18 = int_to_ptr.vmem [resolvable:$true] %s17_s18 }
   0x4   :  { %s477_s21 = scalar_lea.hbm %s676_s1, 2048  ;;  %s479_s26 = scalar_lea.hbm %s676_s1, 4096 }
   0x5   :  { %p478_p0 = scmp.ne.s32.totalorder %s676_s1, %s477_s21  ;;  %p480_p1 = scmp.lt.u32.totalorder %s479_s26, %s477_s21 }
   0x6   :  { %p481_p2 = scmp.lt.u32.totalorder %s477_s21, %s676_s1 }
   0x8   :  { %p482_p3 = por %p481_p2, %p480_p1 }
   0xa   :  { %p483_p4 = pnand %p482_p3, %p478_p0 }
   0xc   :  { %486 = shalt.err (!%p483_p4)
}
   0xd   :  { %s487_s29 = scalar_lea.vmem %s30_s16, 2048  ;;  %p492_p6 = scmp.lt.s32.totalorder %s30_s16, %s30_s16 }
   0xe   :  { %p488_p5 = scmp.ne.s32.totalorder %s30_s16, %s487_s29  ;;  %p493_p7 = scmp.lt.s32.totalorder %s487_s29, %s487_s29 }
  0x10   :  { %p494_p8 = por %p493_p7, %p492_p6 }
  0x12   :  { %p495_p9 = pnand %p494_p8, %p488_p5 }
  0x14   :  { %498 = shalt.err (!%p495_p9)
}
  0x15   :  { %s576_s30 = smov 256   ;;  %s577_s5 = smov 128  }
  0x16   :  { %s578_s6 = smov 8   ;;  %s499_s11 = scalar_lea.hbm %s675_s0, 256 }
  0x17   :  { %35 = dma.hbm_to_vmem [thread:$0]  %s676_s1, 2048, %s30_s16, [#allocation6], %s576_s30, %s577_s5, %s578_s6  }
  0x18   :  { %p500_p10 = scmp.ne.s32.totalorder %s675_s0, %s499_s11  ;;  %p503_p11 = scmp.lt.u32.totalorder %s499_s11, %s675_s0 }
  0x1a   :  { %p505_p12 = pnand %p503_p11, %p500_p10 }
  0x1c   :  { %508 = shalt.err (!%p505_p12)
}
  0x1d   :  { %s509_s17 = scalar_lea.vmem %s18_s18, 256  ;;  %p514_p0 = scmp.lt.s32.totalorder %s18_s18, %s18_s18 }
  0x1e   :  { %p510_p13 = scmp.ne.s32.totalorder %s18_s18, %s509_s17  ;;  %p515_p1 = scmp.lt.s32.totalorder %s509_s17, %s509_s17 }
  0x20   :  { %p516_p2 = por %p515_p1, %p514_p0 }
  0x22   :  { %p517_p3 = pnand %p516_p2, %p510_p13 }
  0x24   :  { %520 = shalt.err (!%p517_p3)
}
  0x25   :  { %23 = dma.hbm_to_vmem [thread:$0]  %s675_s0, 256, %s18_s18, [#allocation3], %s577_s5, %s577_s5, %s578_s6  }
  0x26   :  { %s291_s21 = scalar_lea.hbm %s677_s2, 128  ;;  %s579_s22 = smov [#allocation7]  }
  0x27   :  { %s44_s23 = sshll.u32 %s579_s22, 4  ;;  %s545_s26 = scalar_lea.hbm %s677_s2, 2176  ;;  %s45_s23 = int_to_ptr.vmem [resolvable:$true] %s44_s23 }
  0x28   :  { %p522_p4 = scmp.ne.s32.totalorder %s291_s21, %s545_s26  ;;  %s523_s29 = scalar_lea.hbm %s677_s2, 4096 }
  0x29   :  { %p524_p5 = scmp.lt.u32.totalorder %s291_s21, %s677_s2  ;;  %p525_p6 = scmp.lt.u32.totalorder %s523_s29, %s545_s26 }
  0x2a   :  { %p527_p8 = scmp.lt.u32.totalorder %s545_s26, %s291_s21 }
  0x2b   :  { %p526_p7 = por %p525_p6, %p524_p5 }
  0x2d   :  { %p528_p9 = por %p527_p8, %p526_p7 }
  0x2f   :  { %p529_p10 = pnand %p528_p9, %p522_p4 }
  0x31   :  { %532 = shalt.err (!%p529_p10)
}
  0x32   :  { %s533_s0 = scalar_lea.vmem %s45_s23, 2048  ;;  %p538_p12 = scmp.lt.s32.totalorder %s45_s23, %s45_s23 }
  0x33   :  { %p534_p11 = scmp.ne.s32.totalorder %s45_s23, %s533_s0  ;;  %p539_p13 = scmp.lt.s32.totalorder %s533_s0, %s533_s0 }
  0x35   :  { %p540_p0 = por %p539_p13, %p538_p12 }
  0x37   :  { %p541_p1 = pnand %p540_p0, %p534_p11 }
  0x39   :  { %544 = shalt.err (!%p541_p1)
}
  0x3a   :  { %50 = dma.hbm_to_vmem [thread:$0]  %s291_s21, 2048, %s45_s23, [#allocation6], %s576_s30, %s577_s5, %s578_s6  }
  0x3b   :  { %568 = dma.done.wait [#allocation3], 256  }
  0x3c   :  { %569 = vsyncadd [#allocation3], 4294967040 }
  0x3d   :  { %570 = dma.done.wait [#allocation6], 4096  }
  0x3e   :  { %571 = vsyncadd [#allocation6], 4294963200  ;;  %v81_v0 = vld [vmem:[#allocation7] sm:$0xff]  ;;  %v82_v1 = vld [vmem:[#allocation7 + $0x8] sm:$0xff]  ;;  %s580_s10 = smov [#allocation8]  }
  0x3f   :  { %v83_v2 = vld [vmem:[#allocation7 + $0x10] sm:$0xff]  ;;  %v434_v3 = vpack.c.bf16 %v82_v1, %v81_v0  ;;  %v84_v4 = vld [vmem:[#allocation7 + $0x18] sm:$0xff]  ;;  %v85_v6 = vld [vmem:[#allocation7 + $0x20] sm:$0xff]  ;;  %s278_s11 = sshll.u32 %s580_s10, 4  ;;  %s279_s11 = int_to_ptr.vmem [resolvable:$true] %s278_s11 }
  0x40   :  { %v438_v5 = vpack.c.bf16 %v84_v4, %v83_v2  ;;  %v86_v7 = vld [vmem:[#allocation7 + $0x28] sm:$0xff]  ;;  %v65_v8 = vld [vmem:[#allocation5] sm:$0xff]  ;;  %v67_v11 = vld [vmem:[#allocation5 + $0x10] sm:$0xff]  ;;  %s546_s12 = scalar_lea.vmem %s279_s11, 256  ;;  %p551_p3 = scmp.lt.s32.totalorder %s279_s11, %s279_s11 }
  0x41   :  { %435 = vmatprep.subr.bf16.mxu1 %v434_v3  ;;  %v66_v9 = vld [vmem:[#allocation5 + $0x8] sm:$0xff]  ;;  %v68_v12 = vld [vmem:[#allocation5 + $0x18] sm:$0xff]  ;;  %v442_v13 = vpack.c.bf16 %v86_v7, %v85_v6  ;;  %v69_v15 = vld [vmem:[#allocation5 + $0x20] sm:$0xff]  ;;  %p547_p2 = scmp.ne.s32.totalorder %s279_s11, %s546_s12  ;;  %p552_p4 = scmp.lt.s32.totalorder %s546_s12, %s546_s12 }
  0x42   :  { %437 = vmatpush3.bf16.msra.mxu1 %v434_v3  ;;  %v402_v10 = vpack.c.bf16 %v66_v9, %v65_v8  ;;  %v406_v14 = vpack.c.bf16 %v68_v12, %v67_v11  ;;  %v70_v16 = vld [vmem:[#allocation5 + $0x28] sm:$0xff]  ;;  %v87_v17 = vld [vmem:[#allocation7 + $0x30] sm:$0xff]  ;;  %v88_v18 = vld [vmem:[#allocation7 + $0x38] sm:$0xff] }
  0x43   :  { %439 = vmatprep.subr.bf16.mxu1 %v438_v5  ;;  %v410_v19 = vpack.c.bf16 %v70_v16, %v69_v15  ;;  %v63_v20 = vld [vmem:[#allocation2] sm:$0xff]  ;;  %v446_v21 = vpack.c.bf16 %v88_v18, %v87_v17  ;;  %v72_v23 = vld [vmem:[#allocation5 + $0x38] sm:$0xff]  ;;  %v89_v24 = vld [vmem:[#allocation7 + $0x40] sm:$0xff]  ;;  %p553_p5 = por %p552_p4, %p551_p3 }
  0x44   :  { %403 = vmatprep.subr.bf16.mxu0 %v402_v10  ;;  %v71_v22 = vld [vmem:[#allocation5 + $0x30] sm:$0xff]  ;;  %399 = vmatprep.mubr.f32.mxu1 %v63_v20  ;;  %v90_v25 = vld [vmem:[#allocation7 + $0x48] sm:$0xff]  ;;  %v73_v28 = vld [vmem:[#allocation5 + $0x40] sm:$0xff] }
  0x45   :  { %405 = vmatpush3.bf16.msra.mxu0 %v402_v10  ;;  %364 = vmatprep.mubr.f32.mxu0 %v63_v20  ;;  %v414_v26 = vpack.c.bf16 %v72_v23, %v71_v22  ;;  %v450_v27 = vpack.c.bf16 %v90_v25, %v89_v24  ;;  %v74_v29 = vld [vmem:[#allocation5 + $0x48] sm:$0xff]  ;;  %v91_v30 = vld [vmem:[#allocation7 + $0x50] sm:$0xff]  ;;  %v92_v31 = vld [vmem:[#allocation7 + $0x58] sm:$0xff]  ;;  %p554_p6 = pnand %p553_p5, %p547_p2 }
  0x46   :  { %441 = vmatpush3.bf16.msra.mxu1 %v438_v5  ;;  %407 = vmatprep.subr.bf16.mxu0 %v406_v14  ;;  %v418_v32 = vpack.c.bf16 %v74_v29, %v73_v28  ;;  %v454_v33 = vpack.c.bf16 %v92_v31, %v91_v30  ;;  %v75_v34 = vld [vmem:[#allocation5 + $0x50] sm:$0xff]  ;;  %v76_v35 = vld [vmem:[#allocation5 + $0x58] sm:$0xff]  ;;  %v93_v36 = vld [vmem:[#allocation7 + $0x60] sm:$0xff] }
  0x47   :  { %443 = vmatprep.subr.bf16.mxu1 %v442_v13  ;;  %v94_v37 = vld [vmem:[#allocation7 + $0x68] sm:$0xff]  ;;  %v422_v38 = vpack.c.bf16 %v76_v35, %v75_v34  ;;  %v77_v40 = vld [vmem:[#allocation5 + $0x60] sm:$0xff]  ;;  %v95_v42 = vld [vmem:[#allocation7 + $0x70] sm:$0xff] }
  0x48   :  { %v458_v39 = vpack.c.bf16 %v94_v37, %v93_v36  ;;  %v78_v41 = vld [vmem:[#allocation5 + $0x68] sm:$0xff]  ;;  %v96_v43 = vld [vmem:[#allocation7 + $0x78] sm:$0xff]  ;;  %v79_v46 = vld [vmem:[#allocation5 + $0x70] sm:$0xff] }
  0x49   :  { %409 = vmatpush3.bf16.msra.mxu0 %v406_v14  ;;  %v426_v44 = vpack.c.bf16 %v78_v41, %v77_v40  ;;  %v462_v45 = vpack.c.bf16 %v96_v43, %v95_v42  ;;  %v80_v47 = vld [vmem:[#allocation5 + $0x78] sm:$0xff]  ;;  %v295_v50 = vld [vmem:[%s678_s3 + $0x1] ss:$0 sm:$0xff]  ;;  %v294_v59 = vld [vmem:[%s678_s3] ss:$0 sm:$0xff] }
  0x4a   :  { %445 = vmatpush3.bf16.msra.mxu1 %v442_v13  ;;  %411 = vmatprep.subr.bf16.mxu0 %v410_v19  ;;  %v430_v48 = vpack.c.bf16 %v80_v47, %v79_v46  ;;  %v64_v49 = vld [vmem:[#allocation2 + $0x8] sm:$0xff] }
  0x4b   :  { %447 = vmatprep.subr.bf16.mxu1 %v446_v21 }
  0x4d   :  { %413 = vmatpush3.bf16.msra.mxu0 %v410_v19 }
  0x4e   :  { %449 = vmatpush3.bf16.msra.mxu1 %v446_v21  ;;  %415 = vmatprep.subr.bf16.mxu0 %v414_v26 }
  0x4f   :  { %451 = vmatprep.subr.bf16.mxu1 %v450_v27 }
  0x51   :  { %417 = vmatpush3.bf16.msra.mxu0 %v414_v26 }
  0x52   :  { %453 = vmatpush3.bf16.msra.mxu1 %v450_v27  ;;  %419 = vmatprep.subr.bf16.mxu0 %v418_v32 }
  0x53   :  { %455 = vmatprep.subr.bf16.mxu1 %v454_v33 }
  0x55   :  { %421 = vmatpush3.bf16.msra.mxu0 %v418_v32 }
  0x56   :  { %457 = vmatpush3.bf16.msra.mxu1 %v454_v33  ;;  %423 = vmatprep.subr.bf16.mxu0 %v422_v38 }
  0x57   :  { %459 = vmatprep.subr.bf16.mxu1 %v458_v39 }
  0x59   :  { %425 = vmatpush3.bf16.msra.mxu0 %v422_v38 }
  0x5a   :  { %461 = vmatpush3.bf16.msra.mxu1 %v458_v39  ;;  %427 = vmatprep.subr.bf16.mxu0 %v426_v44 }
  0x5b   :  { %463 = vmatprep.subr.bf16.mxu1 %v462_v45 }
  0x5d   :  { %429 = vmatpush3.bf16.msra.mxu0 %v426_v44 }
  0x5e   :  { %465 = vmatpush3.bf16.msra.mxu1 %v462_v45  ;;  %431 = vmatprep.subr.bf16.mxu0 %v430_v48 }
  0x61   :  { %400 = vmatmul.mubr.f32.vlgmr.msra.gmra.mrb[0].mxu1 %v64_v49  ;;  %433 = vmatpush3.bf16.msra.mxu0 %v430_v48 }
  0x64   :  { %365 = vmatmul.mubr.f32.vlgmr.msra.gmra.mrb[0].mxu0 %v64_v49 }
 0x134   :  { %v401_v51 = vpop.f32.mrb[0].mxu1 }
 0x135   :  { %v256_v52 = vadd.f32 %v401_v51, %v295_v50  ;;  %v250_v53 = vpop.f32.mrb[1].mxu1 }
 0x136   :  { %v251_v54 = vadd.f32 %v295_v50, %v250_v53 }
 0x137   :  { %v262_v55 = vmul.f32 0.70710677, %v256_v52  ;;  %v366_v56 = vpop.f32.mrb[0].mxu0  ;;  %v260_v62 = vmul.f32 0.5, %v256_v52 }
 0x138   :  { %v261_v57 = vmul.f32 0.70710677, %v251_v54  ;;  %v171_v58 = vpop.f32.mrb[1].mxu0  ;;  %v177_v0 = vadd.f32 %v366_v56, %v294_v59  ;;  %v259_v1 = vmul.f32 0.5, %v251_v54 }
 0x139   :  { %473 = verf.f32 %v262_v55  ;;  %v172_v3 = vadd.f32 %v294_v59, %v171_v58 }
 0x13a   :  { %475 = verf.f32 %v261_v57 }
 0x143   :  { %v474_v60 = vpop.eup %473 }
 0x144   :  { %v476_v61 = vpop.eup %475  ;;  %v266_v63 = vadd.f32 1.0, %v474_v60 }
 0x145   :  { %v265_v2 = vadd.f32 1.0, %v476_v61 }
 0x146   :  { %v268_v4 = vmul.f32 %v266_v63, %v260_v62 }
 0x147   :  { %v267_v5 = vmul.f32 %v265_v2, %v259_v1 }
 0x148   :  { %v270_v6 = vmul.f32 %v268_v4, %v177_v0 }
 0x149   :  { %v269_v7 = vmul.f32 %v267_v5, %v172_v3 }
 0x14a   :  { %272 = vst [vmem:[#allocation8 + $0x8] sm:$0xff] %v270_v6 }
 0x14b   :  { %271 = vst [vmem:[#allocation8] sm:$0xff] %v269_v7 }
 0x14c   :  { %557 = shalt.err (!%p554_p6)
}
 0x14d   :  { %s558_s14 = scalar_lea.hbm %s679_s4, 256 }
 0x14e   :  { %p559_p7 = scmp.ne.s32.totalorder %s679_s4, %s558_s14  ;;  %p562_p8 = scmp.lt.u32.totalorder %s558_s14, %s679_s4 }
 0x150   :  { %p564_p9 = pnand %p562_p8, %p559_p7 }
 0x152   :  { %567 = shalt.err (!%p564_p9)
}
 0x153   :  { %284 = dma.vmem_to_hbm [thread:$0]  %s279_s11, 256, %s679_s4, [#allocation4], %s577_s5, %s577_s5, %s578_s6  }
 0x154   :  { %572 = dma.done.wait [#allocation4], 256  }
 0x155   :  { %573 = vsyncadd [#allocation4], 4294967040 }
 0x156   :  { %288 = vsyncpa [#allocation3], 1 }
 0x157   :  { %289 = vsyncpa [#allocation6], 1 }
 0x158   :  { %290 = vsyncpa [#allocation4], 1 }

</bundles_post_ra>
